<compile_context>
chip_gen: v5e
topology: v5e:2x2
jax: 0.10.0
libtpu: 0.0.40
codegen_flags: <defaults>
</compile_context>

<pallas_src>
import jax
import jax.numpy as jnp
from jax.experimental import pallas as pl
from jax.experimental.pallas import tpu as pltpu


# ------------------------- fused RNN + Linear kernel -------------------------
def rnn_fused_kernel(x_ref, h0_ref, wih_ref, whh_ref, brnn_ref,
                     wlin_ref, blin_ref,
                     y_ref, hlast_ref,
                     h_scr, traj_scr):
    ti = pl.program_id(1)                       # time-block index (serial axis)
    b_blk, t_blk, in_dim = x_ref.shape
    hid = h_scr.shape[-1]

    # Weights are loaded once per grid step (single-buffered, constant index).
    wih = wih_ref[...]
    whh = whh_ref[...]
    wlin = wlin_ref[...]
    mxu_dtype = whh.dtype                       # bf16 (default) or f32

    # Initialize the carried hidden state at the start of each batch shard.
    @pl.when(ti == 0)
    def _():
        h_scr[...] = h0_ref[...].astype(jnp.float32)

    # ---- hoisted input projection: one (B*T_BLK, I) @ (I, H) MXU matmul -----
    # Leading-dim merge reshape is layout-preserving (t_blk % 8 == 0 or == T).
    x2d = x_ref[...].reshape(b_blk * t_blk, in_dim).astype(mxu_dtype)
    xp = (jnp.dot(x2d, wih, preferred_element_type=jnp.float32)
          + brnn_ref[...])                      # bias add in f32
    # Stage through scratch so xp is never live across the unrolled recurrence.
    traj_scr[...] = xp.reshape(b_blk, t_blk, hid)

    # ---- serial recurrence: only h_prev @ W_hh^T stays in the loop -----------
    h = h_scr[...]                              # f32 carry
    for tt in range(t_blk):                     # static unroll, static slices
        pre = traj_scr[:, tt, :] + jnp.dot(h.astype(mxu_dtype), whh,
                                           preferred_element_type=jnp.float32)
        h = jnp.tanh(pre)                       # f32 elementwise (EUP)
        traj_scr[:, tt, :] = h                  # overwrite xp slot with h
    h_scr[...] = h                              # carry to the next time block

    # ---- hoisted linear head: one (B*T_BLK, H) @ (H, O) matmul per block -----
    h_all = traj_scr[...].reshape(b_blk * t_blk, hid).astype(mxu_dtype)
    y = (jnp.dot(h_all, wlin, preferred_element_type=jnp.float32)
         + blin_ref[...])
    y_ref[...] = y.reshape(b_blk, t_blk, -1).astype(y_ref.dtype)

    # Store the final hidden state only once, on the last time block.
    # (Relies on the time axis being the LAST, serial/"arbitrary" grid axis.)
    @pl.when(ti == pl.num_programs(1) - 1)
    def _():
        hlast_ref[...] = h.astype(hlast_ref.dtype)


# ------------------------------ tiling helpers --------------------------------
def _choose_t_block(T):
    # Block second-minor dim must be a multiple of 8 or equal the full extent.
    # Larger t_blk amortizes per-grid-step overhead (v6e can afford 64+); 32 is
    # a safe default for v7x's 64 MiB VMEM with the f32 trajectory scratch.
    for cand in (32, 16, 8):
        if T % cand == 0:
            return cand
    return T


def _choose_b_block(B):
    # Target the MXU M dimension for the per-step (b_blk, H) @ (H, H) matmul
    # and, when B allows, >=2 shards so the "parallel" batch axis can split
    # across TensorCores (megacore / v7x).
    for cand in (256, 128):
        if B % cand == 0 and B > cand:
            return cand
    if B >= 16 and B % 2 == 0:
        return B // 2
    return B


def _vmem_limit_bytes(b_blk, t_blk, in_dim, hid, out_dim, w_bytes):
    f32 = 4
    lane = lambda d: max(d, 128)                # last dim is lane-padded
    est = (
        2 * b_blk * t_blk * lane(in_dim) * f32      # x block (double buffered)
        + 2 * b_blk * t_blk * lane(out_dim) * f32   # y block (double buffered)
        + 4 * b_blk * lane(hid) * f32               # h0 + h_last blocks
        + (max(in_dim, 8) + hid) * lane(hid) * w_bytes   # W_ih^T, W_hh^T (1x buf)
        + hid * lane(out_dim) * w_bytes             # W_lin^T (1x buf)
        + 8 * (lane(hid) + lane(out_dim)) * f32     # biases (sublane padded)
        + b_blk * lane(hid) * f32                   # h carry scratch
        + b_blk * t_blk * lane(hid) * f32           # trajectory scratch
    )
    # 2x headroom for compiler-internal scratch / tile padding; clamp to the
    # smallest physical VMEM across target generations (v7x: 64 MiB per TC).
    return int(min(max(2 * est + (2 << 20), 8 << 20), 64 << 20))


# ------------------------------- full module ----------------------------------
def rnn_module_forward(data, hidden_prev, params, *, t_blk=None, b_blk=None,
                       matmul_dtype=jnp.bfloat16):
    """Matches RNN.forward:
       data: (B, T, input_size)  [batch_first]
       hidden_prev: (1, B, hidden_size)
       returns (out (1, B*T, output_size), hidden (1, B, hidden_size))"""
    B, T, I = data.shape
    H = params["w_hh"].shape[0]
    O = params["w_lin"].shape[0]

    if t_blk is None:
        t_blk = _choose_t_block(T)
    if b_blk is None:
        b_blk = _choose_b_block(B)
    assert T % t_blk == 0 and B % b_blk == 0
    n_b, n_t = B // b_blk, T // t_blk

    h0 = hidden_prev[0]                                       # (B, H)
    w_ih_t = params["w_ih"].T.astype(matmul_dtype)            # (I, H)
    w_hh_t = params["w_hh"].T.astype(matmul_dtype)            # (H, H)
    w_lin_t = params["w_lin"].T.astype(matmul_dtype)          # (H, O)
    b_rnn = (params["b_ih"] + params["b_hh"]).reshape(1, H).astype(jnp.float32)
    b_lin = params["b_lin"].reshape(1, O).astype(jnp.float32)

    w_bytes = jnp.dtype(matmul_dtype).itemsize
    vmem_limit = _vmem_limit_bytes(b_blk, t_blk, I, H, O, w_bytes)

    single = pl.Buffered(1)      # grid-invariant operands: no double buffering

    y, h_last = pl.pallas_call(
        rnn_fused_kernel,
        out_shape=(
            jax.ShapeDtypeStruct((B, T, O), jnp.float32),      # linear output
            jax.ShapeDtypeStruct((B, H), jnp.float32),         # h_T
        ),
        grid_spec=pltpu.PrefetchScalarGridSpec(
            num_scalar_prefetch=0,
            grid=(n_b, n_t),                  # (parallel batch, serial time)
            in_specs=[
                pl.BlockSpec((b_blk, t_blk, I), lambda bi, ti: (bi, ti, 0)),   # x
                pl.BlockSpec((b_blk, H), lambda bi, ti: (bi, 0)),              # h0
                pl.BlockSpec((I, H), lambda bi, ti: (0, 0),
                             pipeline_mode=single),                            # W_ih^T
                pl.BlockSpec((H, H), lambda bi, ti: (0, 0),
                             pipeline_mode=single),                            # W_hh^T
                pl.BlockSpec((1, H), lambda bi, ti: (0, 0),
                             pipeline_mode=single),                            # b_ih+b_hh
                pl.BlockSpec((H, O), lambda bi, ti: (0, 0),
                             pipeline_mode=single),                            # W_lin^T
                pl.BlockSpec((1, O), lambda bi, ti: (0, 0),
                             pipeline_mode=single),                            # b_lin
            ],
            out_specs=[
                pl.BlockSpec((b_blk, t_blk, O), lambda bi, ti: (bi, ti, 0)),   # y
                pl.BlockSpec((b_blk, H), lambda bi, ti: (bi, 0)),              # h_last
            ],
            scratch_shapes=[
                pltpu.VMEM((b_blk, H), jnp.float32),           # carried hidden
                pltpu.VMEM((b_blk, t_blk, H), jnp.float32),    # xp / hidden traj
            ],
        ),
        compiler_params=pltpu.CompilerParams(
            dimension_semantics=("parallel", "arbitrary"),
            vmem_limit_bytes=vmem_limit),
    )(data, h0, w_ih_t, w_hh_t, b_rnn, w_lin_t, b_lin)

    # Batch-major (B, T, O) -> (B*T, O) is a free, contiguous reshape
    # (matches PyTorch's out.view(-1, hidden_size) row ordering).
    out = y.reshape(B * T, O)[None, :, :]
    return out, h_last[None, :, :]


# ------------------------------ reference (pure JAX) ---------------------------
def rnn_module_reference(data, hidden_prev, params):
    def step(h, x_t):
        h_new = jnp.tanh(x_t @ params["w_ih"].T + params["b_ih"]
                         + h @ params["w_hh"].T + params["b_hh"])
        return h_new, h_new

    h0 = hidden_prev[0]
    data_tbi = jnp.transpose(data, (1, 0, 2))
    h_last, out_tbh = jax.lax.scan(step, h0, data_tbi)
    B, T, _ = data.shape
    out_flat = jnp.transpose(out_tbh, (1, 0, 2)).reshape(B * T, -1)
    out_lin = out_flat @ params["w_lin"].T + params["b_lin"]
    return out_lin[None, :, :], h_last[None, :, :]


if __name__ == "__main__":
    # small shapes consistent with the module
    batch, seq = 2, 8
    input_size, hidden_size, output_size = 4, 32, 4

    key = jax.random.PRNGKey(0)
    ks = jax.random.split(key, 8)

    # nn.RNN params init'd with normal(0, 0.001); Linear init'd deterministically
    params = {
        "w_ih": 0.001 * jax.random.normal(ks[0], (hidden_size, input_size), jnp.float32),
        "w_hh": 0.001 * jax.random.normal(ks[1], (hidden_size, hidden_size), jnp.float32),
        "b_ih": 0.001 * jax.random.normal(ks[2], (hidden_size,), jnp.float32),
        "b_hh": 0.001 * jax.random.normal(ks[3], (hidden_size,), jnp.float32),
        "w_lin": (1.0 / jnp.sqrt(hidden_size)) *
                 jax.random.uniform(ks[4], (output_size, hidden_size), jnp.float32,
                                    minval=-1.0, maxval=1.0),
        "b_lin": (1.0 / jnp.sqrt(hidden_size)) *
                 jax.random.uniform(ks[5], (output_size,), jnp.float32,
                                    minval=-1.0, maxval=1.0),
    }

    data = jax.random.normal(ks[6], (batch, seq, input_size), jnp.float32)
    hidden_prev = jax.random.normal(ks[7], (1, batch, hidden_size), jnp.float32)

    out_ref, hidden_ref = rnn_module_reference(data, hidden_prev, params)

    # bf16-matmul production path (f32 accumulation): loosened tolerance.
    out, hidden = rnn_module_forward(data, hidden_prev, params)
    out = jax.block_until_ready(out)
    hidden = jax.block_until_ready(hidden)
    assert out.shape == (1, batch * seq, output_size)
    assert hidden.shape == (1, batch, hidden_size)
    assert jnp.allclose(out, out_ref, atol=2e-3, rtol=2e-3), \
        float(jnp.max(jnp.abs(out - out_ref)))
    assert jnp.allclose(hidden, hidden_ref, atol=2e-3, rtol=2e-3), \
        float(jnp.max(jnp.abs(hidden - hidden_ref)))

    # f32-matmul path: bit-tight structural check of the same kernel.
    out32, hidden32 = rnn_module_forward(data, hidden_prev, params,
                                         matmul_dtype=jnp.float32)
    out32 = jax.block_until_ready(out32)
    hidden32 = jax.block_until_ready(hidden32)
    assert jnp.allclose(out32, out_ref, atol=1e-5, rtol=1e-5)
    assert jnp.allclose(hidden32, hidden_ref, atol=1e-5, rtol=1e-5)

    print("KERNEL_OK")
</pallas_src>

<mosaic_0001>
module attributes {stable_mosaic.version = 11 : i64} {
  func.func @rnn_fused_kernel(%arg0: i32, %arg1: i32, %arg2: memref<2x8x4xf32, #tpu.memory_space<vmem>>, %arg3: memref<2x32xf32, #tpu.memory_space<vmem>>, %arg4: memref<4x32xbf16, #tpu.memory_space<vmem>>, %arg5: memref<32x32xbf16, #tpu.memory_space<vmem>>, %arg6: memref<1x32xf32, #tpu.memory_space<vmem>>, %arg7: memref<32x4xbf16, #tpu.memory_space<vmem>>, %arg8: memref<1x4xf32, #tpu.memory_space<vmem>>, %arg9: memref<2x8x4xf32, #tpu.memory_space<vmem>>, %arg10: memref<2x32xf32, #tpu.memory_space<vmem>>, %arg11: memref<2x32xf32, #tpu.memory_space<vmem>>, %arg12: memref<2x8x32xf32, #tpu.memory_space<vmem>>) attributes {dimension_semantics = [#tpu.dimension_semantics<parallel>, #tpu.dimension_semantics<arbitrary>], iteration_bounds = array<i64: 1, 1>, scalar_prefetch = 0 : i64, scratch_operands = 2 : i64, tpu.core_type = #tpu.core_type<tc>, window_params = [{transform_indices = @transform_0, window_bounds = array<i64: 2, 8, 4>}, {transform_indices = @transform_1, window_bounds = array<i64: 2, 32>}, {pipeline_mode = #tpu.pipeline_mode<synchronous>, transform_indices = @transform_2, window_bounds = array<i64: 4, 32>}, {pipeline_mode = #tpu.pipeline_mode<synchronous>, transform_indices = @transform_3, window_bounds = array<i64: 32, 32>}, {pipeline_mode = #tpu.pipeline_mode<synchronous>, transform_indices = @transform_4, window_bounds = array<i64: 1, 32>}, {pipeline_mode = #tpu.pipeline_mode<synchronous>, transform_indices = @transform_5, window_bounds = array<i64: 32, 4>}, {pipeline_mode = #tpu.pipeline_mode<synchronous>, transform_indices = @transform_6, window_bounds = array<i64: 1, 4>}, {transform_indices = @transform_7, window_bounds = array<i64: 2, 8, 4>}, {transform_indices = @transform_8, window_bounds = array<i64: 2, 32>}]} {
    %c0 = arith.constant 0 : index
    %c0_0 = arith.constant 0 : index
    %0 = vector.load %arg4[%c0, %c0_0] : memref<4x32xbf16, #tpu.memory_space<vmem>>, vector<4x32xbf16>
    %c0_1 = arith.constant 0 : index
    %c0_2 = arith.constant 0 : index
    %1 = vector.load %arg5[%c0_1, %c0_2] : memref<32x32xbf16, #tpu.memory_space<vmem>>, vector<32x32xbf16>
    %c0_3 = arith.constant 0 : index
    %c0_4 = arith.constant 0 : index
    %2 = vector.load %arg7[%c0_3, %c0_4] : memref<32x4xbf16, #tpu.memory_space<vmem>>, vector<32x4xbf16>
    %c0_i32 = arith.constant 0 : i32
    %3 = arith.cmpi eq, %arg1, %c0_i32 : i32
    %4 = arith.extui %3 : i1 to i32
    %c0_i32_5 = arith.constant 0 : i32
    %5 = arith.cmpi ne, %4, %c0_i32_5 : i32
    scf.if %5 {
      %c0_78 = arith.constant 0 : index
      %c0_79 = arith.constant 0 : index
      %101 = vector.load %arg3[%c0_78, %c0_79] : memref<2x32xf32, #tpu.memory_space<vmem>>, vector<2x32xf32>
      %c0_80 = arith.constant 0 : index
      %c0_81 = arith.constant 0 : index
      %102 = vector.load %arg11[%c0_80, %c0_81] : memref<2x32xf32, #tpu.memory_space<vmem>>, vector<2x32xf32>
      tpu.vector_store %arg11[%c0_80, %c0_81], %101 {strides = array<i32>} : memref<2x32xf32, #tpu.memory_space<vmem>>, vector<2x32xf32>,
    } else {
    }
    %c0_6 = arith.constant 0 : index
    %c0_7 = arith.constant 0 : index
    %c0_8 = arith.constant 0 : index
    %6 = vector.load %arg2[%c0_6, %c0_7, %c0_8] : memref<2x8x4xf32, #tpu.memory_space<vmem>>, vector<2x8x4xf32>
    %7 = vector.shape_cast %6 : vector<2x8x4xf32> to vector<16x4xf32>
    %8 = arith.truncf %7 : vector<16x4xf32> to vector<16x4xbf16>
    %cst = arith.constant dense<0.000000e+00> : vector<16x32xf32>
    %9 = tpu.matmul %8, %0, %cst {dimension_numbers = #tpu.dot_dimension_numbers<[1], [0], [0], [1], [0, 0, 1, 1], [], []>} : vector<16x4xbf16>, vector<4x32xbf16>, vector<16x32xf32> -> vector<16x32xf32>
    %c0_9 = arith.constant 0 : index
    %c0_10 = arith.constant 0 : index
    %10 = vector.load %arg6[%c0_9, %c0_10] : memref<1x32xf32, #tpu.memory_space<vmem>>, vector<1x32xf32>
    %11 = vector.broadcast %10 : vector<1x32xf32> to vector<16x32xf32>
    %12 = arith.addf %9, %11 : vector<16x32xf32>
    %13 = vector.shape_cast %12 : vector<16x32xf32> to vector<2x8x32xf32>
    %c0_11 = arith.constant 0 : index
    %c0_12 = arith.constant 0 : index
    %c0_13 = arith.constant 0 : index
    %14 = vector.load %arg12[%c0_11, %c0_12, %c0_13] : memref<2x8x32xf32, #tpu.memory_space<vmem>>, vector<2x8x32xf32>
    tpu.vector_store %arg12[%c0_11, %c0_12, %c0_13], %13 {strides = array<i32>} : memref<2x8x32xf32, #tpu.memory_space<vmem>>, vector<2x8x32xf32>,
    %c0_14 = arith.constant 0 : index
    %c0_15 = arith.constant 0 : index
    %15 = vector.load %arg11[%c0_14, %c0_15] : memref<2x32xf32, #tpu.memory_space<vmem>>, vector<2x32xf32>
    %c0_16 = arith.constant 0 : index
    %c0_17 = arith.constant 0 : index
    %c0_18 = arith.constant 0 : index
    %16 = vector.load %arg12[%c0_16, %c0_17, %c0_18] : memref<2x8x32xf32, #tpu.memory_space<vmem>>, vector<2x1x32xf32>
    %17 = vector.shape_cast %16 : vector<2x1x32xf32> to vector<2x32xf32>
    %18 = arith.truncf %15 : vector<2x32xf32> to vector<2x32xbf16>
    %cst_19 = arith.constant dense<0.000000e+00> : vector<2x32xf32>
    %19 = tpu.matmul %18, %1, %cst_19 {dimension_numbers = #tpu.dot_dimension_numbers<[1], [0], [0], [1], [0, 0, 1, 1], [], []>} : vector<2x32xbf16>, vector<32x32xbf16>, vector<2x32xf32> -> vector<2x32xf32>
    %20 = arith.addf %17, %19 : vector<2x32xf32>
    %21 = math.tanh %20 : vector<2x32xf32>
    %c0_20 = arith.constant 0 : index
    %c0_21 = arith.constant 0 : index
    %c0_22 = arith.constant 0 : index
    %22 = vector.load %arg12[%c0_20, %c0_21, %c0_22] : memref<2x8x32xf32, #tpu.memory_space<vmem>>, vector<2x1x32xf32>
    %23 = vector.shape_cast %22 : vector<2x1x32xf32> to vector<2x32xf32>
    %24 = vector.shape_cast %21 : vector<2x32xf32> to vector<2x1x32xf32>
    tpu.vector_store %arg12[%c0_20, %c0_21, %c0_22], %24 {strides = array<i32>} : memref<2x8x32xf32, #tpu.memory_space<vmem>>, vector<2x1x32xf32>,
    %c0_23 = arith.constant 0 : index
    %c1 = arith.constant 1 : index
    %c0_24 = arith.constant 0 : index
    %25 = vector.load %arg12[%c0_23, %c1, %c0_24] : memref<2x8x32xf32, #tpu.memory_space<vmem>>, vector<2x1x32xf32>
    %26 = vector.shape_cast %25 : vector<2x1x32xf32> to vector<2x32xf32>
    %27 = arith.truncf %21 : vector<2x32xf32> to vector<2x32xbf16>
    %cst_25 = arith.constant dense<0.000000e+00> : vector<2x32xf32>
    %28 = tpu.matmul %27, %1, %cst_25 {dimension_numbers = #tpu.dot_dimension_numbers<[1], [0], [0], [1], [0, 0, 1, 1], [], []>} : vector<2x32xbf16>, vector<32x32xbf16>, vector<2x32xf32> -> vector<2x32xf32>
    %29 = arith.addf %26, %28 : vector<2x32xf32>
    %30 = math.tanh %29 : vector<2x32xf32>
    %c0_26 = arith.constant 0 : index
    %c1_27 = arith.constant 1 : index
    %c0_28 = arith.constant 0 : index
    %31 = vector.load %arg12[%c0_26, %c1_27, %c0_28] : memref<2x8x32xf32, #tpu.memory_space<vmem>>, vector<2x1x32xf32>
    %32 = vector.shape_cast %31 : vector<2x1x32xf32> to vector<2x32xf32>
    %33 = vector.shape_cast %30 : vector<2x32xf32> to vector<2x1x32xf32>
    tpu.vector_store %arg12[%c0_26, %c1_27, %c0_28], %33 {strides = array<i32>} : memref<2x8x32xf32, #tpu.memory_space<vmem>>, vector<2x1x32xf32>,
    %c0_29 = arith.constant 0 : index
    %c2 = arith.constant 2 : index
    %c0_30 = arith.constant 0 : index
    %34 = vector.load %arg12[%c0_29, %c2, %c0_30] : memref<2x8x32xf32, #tpu.memory_space<vmem>>, vector<2x1x32xf32>
    %35 = vector.shape_cast %34 : vector<2x1x32xf32> to vector<2x32xf32>
    %36 = arith.truncf %30 : vector<2x32xf32> to vector<2x32xbf16>
    %cst_31 = arith.constant dense<0.000000e+00> : vector<2x32xf32>
    %37 = tpu.matmul %36, %1, %cst_31 {dimension_numbers = #tpu.dot_dimension_numbers<[1], [0], [0], [1], [0, 0, 1, 1], [], []>} : vector<2x32xbf16>, vector<32x32xbf16>, vector<2x32xf32> -> vector<2x32xf32>
    %38 = arith.addf %35, %37 : vector<2x32xf32>
    %39 = math.tanh %38 : vector<2x32xf32>
    %c0_32 = arith.constant 0 : index
    %c2_33 = arith.constant 2 : index
    %c0_34 = arith.constant 0 : index
    %40 = vector.load %arg12[%c0_32, %c2_33, %c0_34] : memref<2x8x32xf32, #tpu.memory_space<vmem>>, vector<2x1x32xf32>
    %41 = vector.shape_cast %40 : vector<2x1x32xf32> to vector<2x32xf32>
    %42 = vector.shape_cast %39 : vector<2x32xf32> to vector<2x1x32xf32>
    tpu.vector_store %arg12[%c0_32, %c2_33, %c0_34], %42 {strides = array<i32>} : memref<2x8x32xf32, #tpu.memory_space<vmem>>, vector<2x1x32xf32>,
    %c0_35 = arith.constant 0 : index
    %c3 = arith.constant 3 : index
    %c0_36 = arith.constant 0 : index
    %43 = vector.load %arg12[%c0_35, %c3, %c0_36] : memref<2x8x32xf32, #tpu.memory_space<vmem>>, vector<2x1x32xf32>
    %44 = vector.shape_cast %43 : vector<2x1x32xf32> to vector<2x32xf32>
    %45 = arith.truncf %39 : vector<2x32xf32> to vector<2x32xbf16>
    %cst_37 = arith.constant dense<0.000000e+00> : vector<2x32xf32>
    %46 = tpu.matmul %45, %1, %cst_37 {dimension_numbers = #tpu.dot_dimension_numbers<[1], [0], [0], [1], [0, 0, 1, 1], [], []>} : vector<2x32xbf16>, vector<32x32xbf16>, vector<2x32xf32> -> vector<2x32xf32>
    %47 = arith.addf %44, %46 : vector<2x32xf32>
    %48 = math.tanh %47 : vector<2x32xf32>
    %c0_38 = arith.constant 0 : index
    %c3_39 = arith.constant 3 : index
    %c0_40 = arith.constant 0 : index
    %49 = vector.load %arg12[%c0_38, %c3_39, %c0_40] : memref<2x8x32xf32, #tpu.memory_space<vmem>>, vector<2x1x32xf32>
    %50 = vector.shape_cast %49 : vector<2x1x32xf32> to vector<2x32xf32>
    %51 = vector.shape_cast %48 : vector<2x32xf32> to vector<2x1x32xf32>
    tpu.vector_store %arg12[%c0_38, %c3_39, %c0_40], %51 {strides = array<i32>} : memref<2x8x32xf32, #tpu.memory_space<vmem>>, vector<2x1x32xf32>,
    %c0_41 = arith.constant 0 : index
    %c4 = arith.constant 4 : index
    %c0_42 = arith.constant 0 : index
    %52 = vector.load %arg12[%c0_41, %c4, %c0_42] : memref<2x8x32xf32, #tpu.memory_space<vmem>>, vector<2x1x32xf32>
    %53 = vector.shape_cast %52 : vector<2x1x32xf32> to vector<2x32xf32>
    %54 = arith.truncf %48 : vector<2x32xf32> to vector<2x32xbf16>
    %cst_43 = arith.constant dense<0.000000e+00> : vector<2x32xf32>
    %55 = tpu.matmul %54, %1, %cst_43 {dimension_numbers = #tpu.dot_dimension_numbers<[1], [0], [0], [1], [0, 0, 1, 1], [], []>} : vector<2x32xbf16>, vector<32x32xbf16>, vector<2x32xf32> -> vector<2x32xf32>
    %56 = arith.addf %53, %55 : vector<2x32xf32>
    %57 = math.tanh %56 : vector<2x32xf32>
    %c0_44 = arith.constant 0 : index
    %c4_45 = arith.constant 4 : index
    %c0_46 = arith.constant 0 : index
    %58 = vector.load %arg12[%c0_44, %c4_45, %c0_46] : memref<2x8x32xf32, #tpu.memory_space<vmem>>, vector<2x1x32xf32>
    %59 = vector.shape_cast %58 : vector<2x1x32xf32> to vector<2x32xf32>
    %60 = vector.shape_cast %57 : vector<2x32xf32> to vector<2x1x32xf32>
    tpu.vector_store %arg12[%c0_44, %c4_45, %c0_46], %60 {strides = array<i32>} : memref<2x8x32xf32, #tpu.memory_space<vmem>>, vector<2x1x32xf32>,
    %c0_47 = arith.constant 0 : index
    %c5 = arith.constant 5 : index
    %c0_48 = arith.constant 0 : index
    %61 = vector.load %arg12[%c0_47, %c5, %c0_48] : memref<2x8x32xf32, #tpu.memory_space<vmem>>, vector<2x1x32xf32>
    %62 = vector.shape_cast %61 : vector<2x1x32xf32> to vector<2x32xf32>
    %63 = arith.truncf %57 : vector<2x32xf32> to vector<2x32xbf16>
    %cst_49 = arith.constant dense<0.000000e+00> : vector<2x32xf32>
    %64 = tpu.matmul %63, %1, %cst_49 {dimension_numbers = #tpu.dot_dimension_numbers<[1], [0], [0], [1], [0, 0, 1, 1], [], []>} : vector<2x32xbf16>, vector<32x32xbf16>, vector<2x32xf32> -> vector<2x32xf32>
    %65 = arith.addf %62, %64 : vector<2x32xf32>
    %66 = math.tanh %65 : vector<2x32xf32>
    %c0_50 = arith.constant 0 : index
    %c5_51 = arith.constant 5 : index
    %c0_52 = arith.constant 0 : index
    %67 = vector.load %arg12[%c0_50, %c5_51, %c0_52] : memref<2x8x32xf32, #tpu.memory_space<vmem>>, vector<2x1x32xf32>
    %68 = vector.shape_cast %67 : vector<2x1x32xf32> to vector<2x32xf32>
    %69 = vector.shape_cast %66 : vector<2x32xf32> to vector<2x1x32xf32>
    tpu.vector_store %arg12[%c0_50, %c5_51, %c0_52], %69 {strides = array<i32>} : memref<2x8x32xf32, #tpu.memory_space<vmem>>, vector<2x1x32xf32>,
    %c0_53 = arith.constant 0 : index
    %c6 = arith.constant 6 : index
    %c0_54 = arith.constant 0 : index
    %70 = vector.load %arg12[%c0_53, %c6, %c0_54] : memref<2x8x32xf32, #tpu.memory_space<vmem>>, vector<2x1x32xf32>
    %71 = vector.shape_cast %70 : vector<2x1x32xf32> to vector<2x32xf32>
    %72 = arith.truncf %66 : vector<2x32xf32> to vector<2x32xbf16>
    %cst_55 = arith.constant dense<0.000000e+00> : vector<2x32xf32>
    %73 = tpu.matmul %72, %1, %cst_55 {dimension_numbers = #tpu.dot_dimension_numbers<[1], [0], [0], [1], [0, 0, 1, 1], [], []>} : vector<2x32xbf16>, vector<32x32xbf16>, vector<2x32xf32> -> vector<2x32xf32>
    %74 = arith.addf %71, %73 : vector<2x32xf32>
    %75 = math.tanh %74 : vector<2x32xf32>
    %c0_56 = arith.constant 0 : index
    %c6_57 = arith.constant 6 : index
    %c0_58 = arith.constant 0 : index
    %76 = vector.load %arg12[%c0_56, %c6_57, %c0_58] : memref<2x8x32xf32, #tpu.memory_space<vmem>>, vector<2x1x32xf32>
    %77 = vector.shape_cast %76 : vector<2x1x32xf32> to vector<2x32xf32>
    %78 = vector.shape_cast %75 : vector<2x32xf32> to vector<2x1x32xf32>
    tpu.vector_store %arg12[%c0_56, %c6_57, %c0_58], %78 {strides = array<i32>} : memref<2x8x32xf32, #tpu.memory_space<vmem>>, vector<2x1x32xf32>,
    %c0_59 = arith.constant 0 : index
    %c7 = arith.constant 7 : index
    %c0_60 = arith.constant 0 : index
    %79 = vector.load %arg12[%c0_59, %c7, %c0_60] : memref<2x8x32xf32, #tpu.memory_space<vmem>>, vector<2x1x32xf32>
    %80 = vector.shape_cast %79 : vector<2x1x32xf32> to vector<2x32xf32>
    %81 = arith.truncf %75 : vector<2x32xf32> to vector<2x32xbf16>
    %cst_61 = arith.constant dense<0.000000e+00> : vector<2x32xf32>
    %82 = tpu.matmul %81, %1, %cst_61 {dimension_numbers = #tpu.dot_dimension_numbers<[1], [0], [0], [1], [0, 0, 1, 1], [], []>} : vector<2x32xbf16>, vector<32x32xbf16>, vector<2x32xf32> -> vector<2x32xf32>
    %83 = arith.addf %80, %82 : vector<2x32xf32>
    %84 = math.tanh %83 : vector<2x32xf32>
    %c0_62 = arith.constant 0 : index
    %c7_63 = arith.constant 7 : index
    %c0_64 = arith.constant 0 : index
    %85 = vector.load %arg12[%c0_62, %c7_63, %c0_64] : memref<2x8x32xf32, #tpu.memory_space<vmem>>, vector<2x1x32xf32>
    %86 = vector.shape_cast %85 : vector<2x1x32xf32> to vector<2x32xf32>
    %87 = vector.shape_cast %84 : vector<2x32xf32> to vector<2x1x32xf32>
    tpu.vector_store %arg12[%c0_62, %c7_63, %c0_64], %87 {strides = array<i32>} : memref<2x8x32xf32, #tpu.memory_space<vmem>>, vector<2x1x32xf32>,
    %c0_65 = arith.constant 0 : index
    %c0_66 = arith.constant 0 : index
    %88 = vector.load %arg11[%c0_65, %c0_66] : memref<2x32xf32, #tpu.memory_space<vmem>>, vector<2x32xf32>
    tpu.vector_store %arg11[%c0_65, %c0_66], %84 {strides = array<i32>} : memref<2x32xf32, #tpu.memory_space<vmem>>, vector<2x32xf32>,
    %c0_67 = arith.constant 0 : index
    %c0_68 = arith.constant 0 : index
    %c0_69 = arith.constant 0 : index
    %89 = vector.load %arg12[%c0_67, %c0_68, %c0_69] : memref<2x8x32xf32, #tpu.memory_space<vmem>>, vector<2x8x32xf32>
    %90 = vector.shape_cast %89 : vector<2x8x32xf32> to vector<16x32xf32>
    %91 = arith.truncf %90 : vector<16x32xf32> to vector<16x32xbf16>
    %cst_70 = arith.constant dense<0.000000e+00> : vector<16x4xf32>
    %92 = tpu.matmul %91, %2, %cst_70 {dimension_numbers = #tpu.dot_dimension_numbers<[1], [0], [0], [1], [0, 0, 1, 1], [], []>} : vector<16x32xbf16>, vector<32x4xbf16>, vector<16x4xf32> -> vector<16x4xf32>
    %c0_71 = arith.constant 0 : index
    %c0_72 = arith.constant 0 : index
    %93 = vector.load %arg8[%c0_71, %c0_72] : memref<1x4xf32, #tpu.memory_space<vmem>>, vector<1x4xf32>
    %94 = vector.broadcast %93 : vector<1x4xf32> to vector<16x4xf32>
    %95 = arith.addf %92, %94 : vector<16x4xf32>
    %96 = vector.shape_cast %95 : vector<16x4xf32> to vector<2x8x4xf32>
    %c0_73 = arith.constant 0 : index
    %c0_74 = arith.constant 0 : index
    %c0_75 = arith.constant 0 : index
    %97 = vector.load %arg9[%c0_73, %c0_74, %c0_75] : memref<2x8x4xf32, #tpu.memory_space<vmem>>, vector<2x8x4xf32>
    tpu.vector_store %arg9[%c0_73, %c0_74, %c0_75], %96 {strides = array<i32>} : memref<2x8x4xf32, #tpu.memory_space<vmem>>, vector<2x8x4xf32>,
    %c0_i32_76 = arith.constant 0 : i32
    %98 = arith.cmpi eq, %arg1, %c0_i32_76 : i32
    %99 = arith.extui %98 : i1 to i32
    %c0_i32_77 = arith.constant 0 : i32
    %100 = arith.cmpi ne, %99, %c0_i32_77 : i32
    scf.if %100 {
      %c0_78 = arith.constant 0 : index
      %c0_79 = arith.constant 0 : index
      %101 = vector.load %arg10[%c0_78, %c0_79] : memref<2x32xf32, #tpu.memory_space<vmem>>, vector<2x32xf32>
      tpu.vector_store %arg10[%c0_78, %c0_79], %84 {strides = array<i32>} : memref<2x32xf32, #tpu.memory_space<vmem>>, vector<2x32xf32>,
    } else {
    }
    return
  }
  func.func @transform_0(%arg0: i32, %arg1: i32) -> (i32, i32, i32) {
    %c0_i32 = arith.constant 0 : i32
    %c0_i32_0 = arith.constant 0 : i32
    return %arg0, %arg1, %c0_i32 : i32, i32, i32
  }
  func.func @transform_1(%arg0: i32, %arg1: i32) -> (i32, i32) {
    %c0_i32 = arith.constant 0 : i32
    %c0_i32_0 = arith.constant 0 : i32
    return %arg0, %c0_i32 : i32, i32
  }
  func.func @transform_2(%arg0: i32, %arg1: i32) -> (i32, i32) {
    %c0_i32 = arith.constant 0 : i32
    %c0_i32_0 = arith.constant 0 : i32
    %c0_i32_1 = arith.constant 0 : i32
    return %c0_i32, %c0_i32_0 : i32, i32
  }
  func.func @transform_3(%arg0: i32, %arg1: i32) -> (i32, i32) {
    %c0_i32 = arith.constant 0 : i32
    %c0_i32_0 = arith.constant 0 : i32
    %c0_i32_1 = arith.constant 0 : i32
    return %c0_i32, %c0_i32_0 : i32, i32
  }
  func.func @transform_4(%arg0: i32, %arg1: i32) -> (i32, i32) {
    %c0_i32 = arith.constant 0 : i32
    %c0_i32_0 = arith.constant 0 : i32
    %c0_i32_1 = arith.constant 0 : i32
    return %c0_i32, %c0_i32_0 : i32, i32
  }
  func.func @transform_5(%arg0: i32, %arg1: i32) -> (i32, i32) {
    %c0_i32 = arith.constant 0 : i32
    %c0_i32_0 = arith.constant 0 : i32
    %c0_i32_1 = arith.constant 0 : i32
    return %c0_i32, %c0_i32_0 : i32, i32
  }
  func.func @transform_6(%arg0: i32, %arg1: i32) -> (i32, i32) {
    %c0_i32 = arith.constant 0 : i32
    %c0_i32_0 = arith.constant 0 : i32
    %c0_i32_1 = arith.constant 0 : i32
    return %c0_i32, %c0_i32_0 : i32, i32
  }
  func.func @transform_7(%arg0: i32, %arg1: i32) -> (i32, i32, i32) {
    %c0_i32 = arith.constant 0 : i32
    %c0_i32_0 = arith.constant 0 : i32
    return %arg0, %arg1, %c0_i32 : i32, i32, i32
  }
  func.func @transform_8(%arg0: i32, %arg1: i32) -> (i32, i32) {
    %c0_i32 = arith.constant 0 : i32
    %c0_i32_0 = arith.constant 0 : i32
    return %arg0, %c0_i32 : i32, i32
  }
}

</mosaic_0001>

<bundles_post_ra>
// kernel: tpu_custom_call.1
= control target key start
LH: loop header
LB: loop body
LE: loop exit
PB: predicated region body
PF: predicated region fallthrough
CT: control target
= control target key end

     0   :  { %vm57_vm0 = vcmask 1041408   ;;  %vm44_vm1 = vcmask 254976   ;;  %vm53_vm2 = vcmask 31744   ;;  %s667_s0 = inlined_call_operand.vmem [shape: f32[2,8,4], index: 0, kind: input, shape index: {}]   ;;  %s668_s1 = inlined_call_operand.vmem [shape: f32[2,32], index: 1, kind: input, shape index: {}]   ;;  %s669_s2 = inlined_call_operand.vmem [shape: bf16[4,32], index: 2, kind: input, shape index: {}]   ;;  %s670_s3 = inlined_call_operand.vmem [shape: bf16[32,32], index: 3, kind: input, shape index: {}]   ;;  %s671_s4 = inlined_call_operand.vmem [shape: f32[1,32], index: 4, kind: input, shape index: {}]   ;;  %s672_s5 = inlined_call_operand.vmem [shape: bf16[32,4], index: 5, kind: input, shape index: {}]   ;;  %s673_s6 = inlined_call_operand.vmem [shape: f32[1,4], index: 6, kind: input, shape index: {}]   ;;  %s674_s7 = inlined_call_operand.vmem [shape: f32[2,8,4], index: 7, kind: output, shape index: {0}]   ;;  %s675_s8 = inlined_call_operand.hbm [shape: f32[2,32], index: 8, kind: output, shape index: {1}]  }
   0x1   :  { %v30_v0 = vld [vmem:[%s669_s2] sm:$0x3]  ;;  %v47_v2 = vld [vmem:[%s667_s0 + $0x8] sm:$0xff] }
   0x2   :  { %v46_v1 = vld [vmem:[%s667_s0] sm:$0xff]  ;;  %v59_v3 = vsel %vm57_vm0, %v30_v0, 0  ;;  %v477_v5 = vld [vmem:[%s670_s3 + $0x8] sm:$0xff] }
   0x3   :  { %v48_v4 = vpack.c.bf16 %v47_v2, %v46_v1  ;;  %v43_v6 = vld [vmem:[%s668_s1] sm:$0x3]  ;;  %68 = vmatpush.bf16.msra.mxu0 %v59_v3  ;;  %103 = vmatpush.bf16.msra.mxu1 %v477_v5 }
   0x4   :  { %45 = vst.msk [vmem:[#allocation2] sm:$0x3] %vm44_vm1, %v43_v6  ;;  %v476_v7 = vld [vmem:[%s670_s3] sm:$0xff]  ;;  %142 = vmatpush.bf16.msra.mxu2 %v477_v5 }
   0x5   :  { %14 = vsyncpa [#allocation5], 0  ;;  %179 = vmatpush.bf16.msra.mxu3 %v477_v5  ;;  %vm75_vm3 = vcmask 261120   ;;  %v481_v10 = vld [vmem:[%s671_s4] ss:$0 sm:$0xff]  ;;  %vm118_vm4 = vcmask 253952  }
   0x6   :  { %450 = vmatmul.msk.bf16.vlgmr.msra.gmra.mxu0 %vm53_vm2, %v48_v4  ;;  %vm130_vm5 = vcmask 1041409   ;;  %s439_s21 = sshll.u32 %s675_s8, 4  ;;  %s440_s21 = int_to_ptr.hbm [resolvable:$true] %s439_s21 }
   0x7   :  { %216 = vmatpush.bf16.msrb.mxu0 %v477_v5  ;;  %104 = vmatpush.bf16.msra.mxu1 %v476_v7 }
   0x8   :  { %143 = vmatpush.bf16.msra.mxu2 %v476_v7 }
   0x9   :  { %180 = vmatpush.bf16.msra.mxu3 %v476_v7 }
   0xb   :  { %217 = vmatpush.bf16.msrb.mxu0 %v476_v7  ;;  %v78_v8 = vld [vmem:[#allocation2] sm:$0x3]  ;;  %253 = vmatpush.bf16.msrb.mxu1 %v477_v5 }
   0xc   :  { %290 = vmatpush.bf16.msrb.mxu2 %v477_v5  ;;  %v81_v9 = vpack.c.bf16 %v78_v8, %v78_v8 }
   0xd   :  { %327 = vmatpush.bf16.msrb.mxu3 %v477_v5 }
   0xe   :  { %459 = vmatmul.msk.bf16.vlgmr.msra.gmra.mxu1 %vm75_vm3, %v81_v9 }
   0xf   :  { %364 = vmatpush.bf16.msra.mxu0 %v477_v5  ;;  %254 = vmatpush.bf16.msrb.mxu1 %v476_v7 }
  0x10   :  { %291 = vmatpush.bf16.msrb.mxu2 %v476_v7 }
  0x11   :  { %328 = vmatpush.bf16.msrb.mxu3 %v476_v7 }
  0x13   :  { %365 = vmatpush.bf16.msra.mxu0 %v476_v7 }
  0x83   :  { %v70_v11 = vpop.f32.mrf.mxu0 }
  0x84   :  { %v71_v12 = vadd.f32 %v481_v10, %v70_v11 }
  0x86   :  { %76 = vst.msk [vmem:[#allocation3] sm:$0xff] %vm75_vm3, %v71_v12 }
  0x8b   :  { %v106_v13 = vpop.f32.mrf.mxu1  ;;  %v72_v14 = vpop.f32.mrf.mxu0 }
  0x8c   :  { %v73_v15 = vadd.f32 %v481_v10, %v72_v14  ;;  %v111_v18 = vrot.slane %v106_v13, 1 }
  0x8d   :  { %v79_v16 = vld [vmem:[#allocation3] sm:$0x1]  ;;  %v121_v31 = vld [vmem:[#allocation3 + $0x1] sm:$0x1]  ;;  %v159_v47 = vld [vmem:[#allocation3 + $0x2] sm:$0x1] }
  0x8e   :  { %77 = vst.msk [vmem:[#allocation3 + $0x8] sm:$0xff] %vm75_vm3, %v73_v15  ;;  %v114_v17 = vadd.f32 %v106_v13, %v79_v16  ;;  %v196_v63 = vld [vmem:[#allocation3 + $0x3] sm:$0x1]  ;;  %v233_v15 = vld [vmem:[#allocation3 + $0x4] sm:$0x1] }
  0x90   :  { %483 = vtanh.f32 %v114_v17 }
  0x93   :  { %v108_v19 = vpop.f32.mrf.mxu1 }
  0x95   :  { %v80_v20 = vld [vmem:[#allocation3 + $0x8] sm:$0x1]  ;;  %v122_v35 = vld [vmem:[#allocation3 + $0x9] sm:$0x1]  ;;  %v160_v51 = vld [vmem:[#allocation3 + $0xa] sm:$0x1] }
  0x96   :  { %v484_v21 = vpop.eup %483  ;;  %v115_v22 = vadd.f32 %v111_v18, %v80_v20  ;;  %v197_v3 = vld [vmem:[#allocation3 + $0xb] sm:$0x1]  ;;  %v234_v19 = vld [vmem:[#allocation3 + $0xc] sm:$0x1] }
  0x97   :  { %119 = vst.msk [vmem:[#allocation3] sm:$0x1] %vm118_vm4, %v484_v21  ;;  %v123_v24 = vpack.c.bf16 %v484_v21, %v484_v21 }
  0x98   :  { %485 = vtanh.f32 %v115_v22 }
  0x99   :  { %v127_v27 = vunpack.c.l.b16 %v123_v24 }
  0x9e   :  { %v486_v23 = vpop.eup %485 }
  0x9f   :  { %120 = vst.msk [vmem:[#allocation3 + $0x8] sm:$0x1] %vm118_vm4, %v486_v23  ;;  %v124_v25 = vpack.c.bf16 %v486_v23, %v486_v23 }
  0xa1   :  { %v128_v26 = vunpack.c.l.b16 %v124_v25 }
  0xa3   :  { %v129_v28 = vrot.slane %v128_v26, 7 }
  0xa5   :  { %v131_v29 = vsel %vm130_vm5, %v129_v28, %v127_v27 }
  0xa6   :  { %v132_v30 = vpack.c.b16 %v131_v29, %v131_v29 }
  0xa8   :  { %460 = vmatmul.msk.bf16.vlgmr.msra.gmra.mxu2 %vm75_vm3, %v132_v30 }
 0x12b   :  { %v145_v32 = vpop.f32.mrf.mxu2 }
 0x12c   :  { %v150_v33 = vrot.slane %v145_v32, 1  ;;  %v153_v34 = vadd.f32 %v145_v32, %v121_v31  ;;  %v270_v31 = vld [vmem:[#allocation3 + $0x5] sm:$0x1] }
 0x12e   :  { %v154_v36 = vadd.f32 %v150_v33, %v122_v35  ;;  %487 = vtanh.f32 %v153_v34  ;;  %v271_v35 = vld [vmem:[#allocation3 + $0xd] sm:$0x1] }
 0x130   :  { %489 = vtanh.f32 %v154_v36 }
 0x133   :  { %v147_v37 = vpop.f32.mrf.mxu2 }
 0x134   :  { %v488_v38 = vpop.eup %487 }
 0x135   :  { %157 = vst.msk [vmem:[#allocation3 + $0x1] sm:$0x1] %vm118_vm4, %v488_v38  ;;  %v161_v40 = vpack.c.bf16 %v488_v38, %v488_v38 }
 0x136   :  { %v490_v39 = vpop.eup %489 }
 0x137   :  { %158 = vst.msk [vmem:[#allocation3 + $0x9] sm:$0x1] %vm118_vm4, %v490_v39  ;;  %v162_v41 = vpack.c.bf16 %v490_v39, %v490_v39  ;;  %v165_v43 = vunpack.c.l.b16 %v161_v40 }
 0x139   :  { %v166_v42 = vunpack.c.l.b16 %v162_v41 }
 0x13b   :  { %v167_v44 = vrot.slane %v166_v42, 7 }
 0x13d   :  { %v168_v45 = vsel %vm130_vm5, %v167_v44, %v165_v43 }
 0x13e   :  { %v169_v46 = vpack.c.b16 %v168_v45, %v168_v45 }
 0x140   :  { %461 = vmatmul.msk.bf16.vlgmr.msra.gmra.mxu3 %vm75_vm3, %v169_v46 }
 0x1c3   :  { %v182_v48 = vpop.f32.mrf.mxu3 }
 0x1c4   :  { %v187_v49 = vrot.slane %v182_v48, 1  ;;  %v190_v50 = vadd.f32 %v182_v48, %v159_v47  ;;  %v307_v47 = vld [vmem:[#allocation3 + $0x6] sm:$0x1] }
 0x1c6   :  { %v191_v52 = vadd.f32 %v187_v49, %v160_v51  ;;  %491 = vtanh.f32 %v190_v50  ;;  %v308_v51 = vld [vmem:[#allocation3 + $0xe] sm:$0x1] }
 0x1c8   :  { %493 = vtanh.f32 %v191_v52 }
 0x1cb   :  { %v184_v53 = vpop.f32.mrf.mxu3 }
 0x1cc   :  { %v492_v54 = vpop.eup %491 }
 0x1cd   :  { %194 = vst.msk [vmem:[#allocation3 + $0x2] sm:$0x1] %vm118_vm4, %v492_v54  ;;  %v198_v56 = vpack.c.bf16 %v492_v54, %v492_v54 }
 0x1ce   :  { %v494_v55 = vpop.eup %493 }
 0x1cf   :  { %195 = vst.msk [vmem:[#allocation3 + $0xa] sm:$0x1] %vm118_vm4, %v494_v55  ;;  %v199_v57 = vpack.c.bf16 %v494_v55, %v494_v55  ;;  %v202_v59 = vunpack.c.l.b16 %v198_v56 }
 0x1d1   :  { %v203_v58 = vunpack.c.l.b16 %v199_v57 }
 0x1d3   :  { %v204_v60 = vrot.slane %v203_v58, 7 }
 0x1d5   :  { %v205_v61 = vsel %vm130_vm5, %v204_v60, %v202_v59 }
 0x1d6   :  { %v206_v62 = vpack.c.b16 %v205_v61, %v205_v61 }
 0x1d8   :  { %462 = vmatmul.msk.bf16.vlgmr.msrb.gmra.mxu0 %vm75_vm3, %v206_v62 }
 0x255   :  { %v219_v0 = vpop.f32.mrf.mxu0 }
 0x256   :  { %v224_v1 = vrot.slane %v219_v0, 1  ;;  %v227_v2 = vadd.f32 %v219_v0, %v196_v63  ;;  %v479_v63 = vld [vmem:[%s672_s5 + $0x8] sm:$0xff]  ;;  %v478_v0 = vld [vmem:[%s672_s5] sm:$0xff]  ;;  %s541_s5 = smov [#allocation4]  }
 0x257   :  { %416 = vmatpush.bf16.msra.mxu1 %v479_v63  ;;  %s437_s18 = sshll.u32 %s541_s5, 4  ;;  %s438_s18 = int_to_ptr.vmem [resolvable:$true] %s437_s18 }
 0x258   :  { %v228_v4 = vadd.f32 %v224_v1, %v197_v3  ;;  %495 = vtanh.f32 %v227_v2  ;;  %v344_v1 = vld [vmem:[#allocation3 + $0x7] sm:$0x1] }
 0x25a   :  { %497 = vtanh.f32 %v228_v4 }
 0x25b   :  { %417 = vmatpush.bf16.msra.mxu1 %v478_v0 }
 0x25d   :  { %v221_v5 = vpop.f32.mrf.mxu0 }
 0x25e   :  { %v496_v6 = vpop.eup %495  ;;  %v345_v5 = vld [vmem:[#allocation3 + $0xf] sm:$0x1] }
 0x25f   :  { %231 = vst.msk [vmem:[#allocation3 + $0x3] sm:$0x1] %vm118_vm4, %v496_v6  ;;  %v235_v8 = vpack.c.bf16 %v496_v6, %v496_v6 }
 0x260   :  { %v498_v7 = vpop.eup %497 }
 0x261   :  { %232 = vst.msk [vmem:[#allocation3 + $0xb] sm:$0x1] %vm118_vm4, %v498_v7  ;;  %v236_v9 = vpack.c.bf16 %v498_v7, %v498_v7  ;;  %v239_v11 = vunpack.c.l.b16 %v235_v8 }
 0x263   :  { %v240_v10 = vunpack.c.l.b16 %v236_v9 }
 0x265   :  { %v241_v12 = vrot.slane %v240_v10, 7 }
 0x267   :  { %v242_v13 = vsel %vm130_vm5, %v241_v12, %v239_v11 }
 0x268   :  { %v243_v14 = vpack.c.b16 %v242_v13, %v242_v13 }
 0x26a   :  { %463 = vmatmul.msk.bf16.vlgmr.msrb.gmra.mxu1 %vm75_vm3, %v243_v14 }
 0x2e7   :  { %v256_v16 = vpop.f32.mrf.mxu1 }
 0x2e8   :  { %v261_v17 = vrot.slane %v256_v16, 1  ;;  %v264_v18 = vadd.f32 %v256_v16, %v233_v15  ;;  %v482_v15 = vld [vmem:[%s673_s6] ss:$0 sm:$0xff] }
 0x2ea   :  { %v265_v20 = vadd.f32 %v261_v17, %v234_v19  ;;  %499 = vtanh.f32 %v264_v18 }
 0x2ec   :  { %501 = vtanh.f32 %v265_v20 }
 0x2ef   :  { %v258_v21 = vpop.f32.mrf.mxu1 }
 0x2f0   :  { %v500_v22 = vpop.eup %499 }
 0x2f1   :  { %268 = vst.msk [vmem:[#allocation3 + $0x4] sm:$0x1] %vm118_vm4, %v500_v22  ;;  %v272_v24 = vpack.c.bf16 %v500_v22, %v500_v22 }
 0x2f2   :  { %v502_v23 = vpop.eup %501 }
 0x2f3   :  { %269 = vst.msk [vmem:[#allocation3 + $0xc] sm:$0x1] %vm118_vm4, %v502_v23  ;;  %v273_v25 = vpack.c.bf16 %v502_v23, %v502_v23  ;;  %v276_v27 = vunpack.c.l.b16 %v272_v24 }
 0x2f5   :  { %v277_v26 = vunpack.c.l.b16 %v273_v25 }
 0x2f7   :  { %v278_v28 = vrot.slane %v277_v26, 7 }
 0x2f9   :  { %v279_v29 = vsel %vm130_vm5, %v278_v28, %v276_v27 }
 0x2fa   :  { %v280_v30 = vpack.c.b16 %v279_v29, %v279_v29 }
 0x2fc   :  { %464 = vmatmul.msk.bf16.vlgmr.msrb.gmra.mxu2 %vm75_vm3, %v280_v30 }
 0x37f   :  { %v293_v32 = vpop.f32.mrf.mxu2 }
 0x380   :  { %v298_v33 = vrot.slane %v293_v32, 1  ;;  %v301_v34 = vadd.f32 %v293_v32, %v270_v31 }
 0x382   :  { %v302_v36 = vadd.f32 %v298_v33, %v271_v35  ;;  %503 = vtanh.f32 %v301_v34 }
 0x384   :  { %505 = vtanh.f32 %v302_v36 }
 0x387   :  { %v295_v37 = vpop.f32.mrf.mxu2 }
 0x388   :  { %v504_v38 = vpop.eup %503 }
 0x389   :  { %305 = vst.msk [vmem:[#allocation3 + $0x5] sm:$0x1] %vm118_vm4, %v504_v38  ;;  %v309_v40 = vpack.c.bf16 %v504_v38, %v504_v38 }
 0x38a   :  { %v506_v39 = vpop.eup %505 }
 0x38b   :  { %306 = vst.msk [vmem:[#allocation3 + $0xd] sm:$0x1] %vm118_vm4, %v506_v39  ;;  %v310_v41 = vpack.c.bf16 %v506_v39, %v506_v39  ;;  %v313_v43 = vunpack.c.l.b16 %v309_v40 }
 0x38d   :  { %v314_v42 = vunpack.c.l.b16 %v310_v41 }
 0x38f   :  { %v315_v44 = vrot.slane %v314_v42, 7 }
 0x391   :  { %v316_v45 = vsel %vm130_vm5, %v315_v44, %v313_v43 }
 0x392   :  { %v317_v46 = vpack.c.b16 %v316_v45, %v316_v45 }
 0x394   :  { %465 = vmatmul.msk.bf16.vlgmr.msrb.gmra.mxu3 %vm75_vm3, %v317_v46 }
 0x417   :  { %v330_v48 = vpop.f32.mrf.mxu3 }
 0x418   :  { %v335_v49 = vrot.slane %v330_v48, 1  ;;  %v338_v50 = vadd.f32 %v330_v48, %v307_v47 }
 0x41a   :  { %v339_v52 = vadd.f32 %v335_v49, %v308_v51  ;;  %507 = vtanh.f32 %v338_v50 }
 0x41c   :  { %509 = vtanh.f32 %v339_v52 }
 0x41f   :  { %v332_v53 = vpop.f32.mrf.mxu3 }
 0x420   :  { %v508_v54 = vpop.eup %507 }
 0x421   :  { %342 = vst.msk [vmem:[#allocation3 + $0x6] sm:$0x1] %vm118_vm4, %v508_v54  ;;  %v346_v56 = vpack.c.bf16 %v508_v54, %v508_v54 }
 0x422   :  { %v510_v55 = vpop.eup %509 }
 0x423   :  { %343 = vst.msk [vmem:[#allocation3 + $0xe] sm:$0x1] %vm118_vm4, %v510_v55  ;;  %v347_v57 = vpack.c.bf16 %v510_v55, %v510_v55  ;;  %v350_v59 = vunpack.c.l.b16 %v346_v56 }
 0x425   :  { %v351_v58 = vunpack.c.l.b16 %v347_v57 }
 0x427   :  { %v352_v60 = vrot.slane %v351_v58, 7 }
 0x429   :  { %v353_v61 = vsel %vm130_vm5, %v352_v60, %v350_v59 }
 0x42a   :  { %v354_v62 = vpack.c.b16 %v353_v61, %v353_v61 }
 0x42c   :  { %466 = vmatmul.msk.bf16.vlgmr.msra.gmra.mxu0 %vm75_vm3, %v354_v62 }
 0x4a9   :  { %v367_v2 = vpop.f32.mrf.mxu0 }
 0x4aa   :  { %v372_v3 = vrot.slane %v367_v2, 1  ;;  %v375_v4 = vadd.f32 %v367_v2, %v344_v1 }
 0x4ac   :  { %v376_v6 = vadd.f32 %v372_v3, %v345_v5  ;;  %511 = vtanh.f32 %v375_v4 }
 0x4ae   :  { %513 = vtanh.f32 %v376_v6 }
 0x4b1   :  { %v369_v7 = vpop.f32.mrf.mxu0 }
 0x4b2   :  { %v512_v8 = vpop.eup %511 }
 0x4b3   :  { %379 = vst.msk [vmem:[#allocation3 + $0x7] sm:$0x1] %vm118_vm4, %v512_v8 }
 0x4b4   :  { %v514_v9 = vpop.eup %513 }
 0x4b5   :  { %380 = vst.msk [vmem:[#allocation3 + $0xf] sm:$0x1] %vm118_vm4, %v514_v9  ;;  %v383_v10 = vrot.slane %v514_v9, 7 }
 0x4b7   :  { %v384_v11 = vsel %vm130_vm5, %v383_v10, %v512_v8 }
 0x4b8   :  { %387 = vst.msk [vmem:[#allocation2] sm:$0x3] %vm44_vm1, %v384_v11 }
 0x4b9   :  { %429 = vst.msk [vmem:[#allocation4] sm:$0x3] %vm44_vm1, %v384_v11 }
 0x4ba   :  { %v388_v12 = vld [vmem:[#allocation3] sm:$0xff]  ;;  %442 = dma.vmem_to_hbm [thread:$0]  %s438_s18, 32, %s440_s21, [#allocation5]  }
 0x4bc   :  { %v389_v13 = vld [vmem:[#allocation3 + $0x8] sm:$0xff] }
 0x4bd   :  { %v390_v14 = vpack.c.bf16 %v389_v13, %v388_v12 }
 0x4bf   :  { %475 = vmatmul.msk.bf16.vlgmr.msra.gmra.mxu1 %vm75_vm3, %v390_v14 }
 0x53c   :  { %v419_v16 = vpop.f32.mrf.mxu1 }
 0x53d   :  { %v420_v17 = vadd.f32 %v482_v15, %v419_v16 }
 0x53f   :  { %424 = vst.msk [vmem:[%s674_s7] sm:$0xff] %vm53_vm2, %v420_v17 }
 0x544   :  { %v421_v18 = vpop.f32.mrf.mxu1 }
 0x545   :  { %v422_v19 = vadd.f32 %v482_v15, %v421_v18 }
 0x547   :  { %425 = vst.msk [vmem:[%s674_s7 + $0x8] sm:$0xff] %vm53_vm2, %v422_v19 }
 0x548   :  { %539 = dma.done.wait [#allocation5], 32  }
 0x549   :  { %540 = vsyncadd [#allocation5], 4294967264 }
 0x54a   :  { %449 = vsyncpa [#allocation5], 1 }

</bundles_post_ra>
